<compile_context>
chip_gen: v6e
topology: v6e:2x2x1
jax: 0.10.0
libtpu: 0.0.40
codegen_flags: <defaults>
</compile_context>

<pallas_src>
import functools

import jax
import jax.numpy as jnp
from jax.experimental import pallas as pl
from jax.experimental.pallas import tpu as pltpu


def _round_up(x, m):
    return (x + m - 1) // m * m


def _cdiv(a, b):
    return (a + b - 1) // b


def _vq_kernel(z_ref, emb_ref, embt_ref, esq_ref, zq_ref, loss_ref, *,
               rem, scores_in_bf16):
    """One (C, T) spatial tile of one batch element.

    z_ref:    (C=D, T)  activation tile, NCHW layout (spatial = lane axis)
    emb_ref:  (K, D)    codebook
    embt_ref: (D, K)    codebook transposed (hoisted to wrapper)
    esq_ref:  (K, 1)    per-code squared norms (hoisted to wrapper)
    zq_ref:   (C=D, T)  quantized output tile
    loss_ref: (8, 128)  per-tile partial sum of squared error (broadcast)
    rem:      static; number of valid lanes in the LAST spatial tile
              (0 means every tile is full -> no masking anywhere).
    """
    z = z_ref[...].astype(jnp.float32)            # (D, T)
    e = emb_ref[...].astype(jnp.float32)          # (K, D)
    e_t = embt_ref[...].astype(jnp.float32)       # (D, K)
    e_sq = esq_ref[...].astype(jnp.float32)       # (K, 1)
    k = e.shape[0]
    t = z.shape[1]

    # Squared distance up to a per-column constant: ||e||^2 - 2 * e @ z.
    if scores_in_bf16:
        # Optional (mainly a v5e MXU win); may flip near-tie argmins.
        scores = jnp.dot(e.astype(jnp.bfloat16), z.astype(jnp.bfloat16),
                         preferred_element_type=jnp.float32)     # (K, T)
    else:
        scores = jnp.dot(e, z, preferred_element_type=jnp.float32)  # (K, T)
    dist = e_sq - 2.0 * scores                                       # (K, T)

    # argmin over the codebook axis, first-index tie-break (matches torch).
    min_val = jnp.min(dist, axis=0, keepdims=True)                   # (1, T)
    iota_k = jax.lax.broadcasted_iota(jnp.int32, (k, t), 0)          # (K, T)
    idx = jnp.min(jnp.where(dist == min_val, iota_k, k), axis=0,
                  keepdims=True)                                     # (1, T)
    one_hot = (iota_k == idx).astype(jnp.float32)                    # (K, T)

    # Gather the quantized vectors on the MXU: z_q = emb.T @ one_hot.
    z_q = jnp.dot(e_t, one_hot, preferred_element_type=jnp.float32)  # (D, T)
    zq_ref[...] = z_q.astype(zq_ref.dtype)
    # (On a ragged last tile the out-of-bounds lanes are dropped by Pallas.)

    diff_sq = (z - z_q) ** 2                                          # (D, T)

    def _store_partial(val):
        loss_ref[...] = jnp.broadcast_to(val, loss_ref.shape).astype(
            loss_ref.dtype)

    if rem == 0:
        # Every spatial tile is full: no iota, no compare, no mask anywhere.
        _store_partial(jnp.sum(diff_sq))
    else:
        is_last = pl.program_id(1) == pl.num_programs(1) - 1

        @pl.when(jnp.logical_not(is_last))
        def _():
            _store_partial(jnp.sum(diff_sq))

        @pl.when(is_last)
        def _():
            # Only the last tile carries padded lanes; use a select (not a
            # multiply) so garbage reads (possibly inf/nan) never reach the sum.
            col = jax.lax.broadcasted_iota(jnp.int32, (1, t), 1)
            _store_partial(jnp.sum(jnp.where(col < rem, diff_sq, 0.0)))


@functools.partial(jax.jit, static_argnames=("beta", "use_moving_avg",
                                             "tile_hw", "scores_in_bf16"))
def vqvae_layer_forward(x, emb_weight, *, beta=0.25, use_moving_avg=False,
                        tile_hw=4096, scores_in_bf16=False):
    """x: (B, C=emb_dim, H, W) float;  emb_weight: (n_embs, emb_dim)."""
    B, C, H, W = x.shape
    K, D = emb_weight.shape
    assert C == D

    hw = H * W
    lane = 128

    # ---- spatial tile selection -------------------------------------------
    # Rough live-VMEM bytes per lane column (f32): double-buffered z / z_q
    # streams (4*C) plus (K,T) temporaries (scores, dist, iota, one_hot, ...)
    # and (D,T) temporaries inside the body.
    bytes_per_col = 4 * (4 * C + 8 * K + 3 * C)
    vmem_budget = 40 * 1024 * 1024           # conservative for v7x (64 MiB phys)
    tile_vmem_cap = max(lane, (vmem_budget // bytes_per_col) // lane * lane)

    if hw <= lane:
        tile = hw                            # single full-extent lane block
    else:
        tile_base = (hw // lane) * lane      # largest 128-multiple <= hw
        tile = max(lane, min(_round_up(tile_hw, lane), tile_base,
                             tile_vmem_cap))
        # v7x megacore: prefer >= 8 total grid steps so both TensorCores get
        # work, but never shrink below 512 lanes/step (overhead amortization).
        while B * _cdiv(hw, tile) < 8 and tile > 4 * lane:
            tile = max(_round_up(tile // 2, lane), 4 * lane)
    n_t = _cdiv(hw, tile)
    rem = hw % tile                          # valid lanes in the last tile

    # NCHW viewed as (B, C, H*W): reshape is metadata-only, no pad, no copy.
    x_f = x.astype(jnp.float32).reshape(B, C, hw)

    emb = emb_weight.astype(jnp.float32)                  # (K, D)
    emb_t = emb.T                                         # (D, K) hoisted
    e_sq = jnp.sum(emb * emb, axis=-1, keepdims=True)     # (K, 1) hoisted

    kernel = functools.partial(_vq_kernel, rem=rem,
                               scores_in_bf16=scores_in_bf16)

    vmem_limit = int(min(max(bytes_per_col * tile + (4 << 20), 32 << 20),
                         56 << 20))

    zq_flat, loss_part = pl.pallas_call(
        kernel,
        out_shape=(jax.ShapeDtypeStruct((B, C, hw), jnp.float32),
                   jax.ShapeDtypeStruct((B, n_t, 8, 128), jnp.float32)),
        grid_spec=pltpu.PrefetchScalarGridSpec(
            num_scalar_prefetch=0,
            grid=(B, n_t),
            in_specs=[
                pl.BlockSpec((None, C, tile), lambda b, t: (b, 0, t)),
                pl.BlockSpec((K, D), lambda b, t: (0, 0)),
                pl.BlockSpec((D, K), lambda b, t: (0, 0)),
                pl.BlockSpec((K, 1), lambda b, t: (0, 0)),
            ],
            out_specs=(
                pl.BlockSpec((None, C, tile), lambda b, t: (b, 0, t)),
                pl.BlockSpec((None, None, 8, 128), lambda b, t: (b, t, 0, 0)),
            ),
        ),
        compiler_params=pltpu.CompilerParams(
            dimension_semantics=("parallel", "parallel"),
            vmem_limit_bytes=vmem_limit),
    )(x_f, emb, emb_t, e_sq)

    # Sum the independent per-tile partials -> MSE over B*C*H*W elements.
    mse = jnp.sum(loss_part[:, :, 0, 0]) / (B * C * H * W)
    if use_moving_avg:
        vq_loss = beta * mse
    else:
        vq_loss = mse + beta * mse            # codebook + beta * commit

    # Straight-through forward value == z_q; already NCHW, metadata reshape.
    z_q = zq_flat.reshape(B, C, H, W)
    return vq_loss, z_q


if __name__ == "__main__":
    # Module hyper-params (deterministic, synthetic).
    n_embs = 64
    emb_dim = 32
    beta = 0.25

    key = jax.random.PRNGKey(0)
    k_x, k_emb, k_x2 = jax.random.split(key, 3)
    # emb.weight.data.normal_()
    emb_weight = jax.random.normal(k_emb, (n_embs, emb_dim), dtype=jnp.float32)

    def reference(x, emb_w, beta, use_moving_avg):
        B, C, H, W = x.shape
        z_e = jnp.transpose(x, (0, 2, 3, 1)).reshape(-1, C)
        d = (jnp.sum(z_e**2, -1, keepdims=True)
             - 2.0 * z_e @ emb_w.T
             + jnp.sum(emb_w**2, -1)[None, :])
        idx = jnp.argmin(d, axis=-1)
        zq = emb_w[idx].reshape(B, H, W, C).transpose(0, 3, 1, 2)
        mse = jnp.mean((x - zq) ** 2)
        loss = beta * mse if use_moving_avg else mse + beta * mse
        return loss, zq

    # Test 1: lane-aligned spatial extent (hw % 128 == 0), common case.
    x1 = jax.random.normal(k_x, (2, emb_dim, 16, 16), dtype=jnp.float32)
    loss1, zq1 = vqvae_layer_forward(x1, emb_weight, beta=beta,
                                     use_moving_avg=False)
    jax.block_until_ready((loss1, zq1))
    loss1_ref, zq1_ref = reference(x1, emb_weight, beta, False)
    assert jnp.allclose(zq1, zq1_ref, atol=1e-5), "z_q mismatch (aligned)"
    assert jnp.allclose(loss1, loss1_ref, atol=1e-5), "loss mismatch (aligned)"

    # Test 2: ragged spatial extent (hw % tile != 0) exercises the masked
    # last-tile path; also covers the use_moving_avg=True loss branch.
    x2 = jax.random.normal(k_x2, (2, emb_dim, 10, 13), dtype=jnp.float32)
    loss2, zq2 = vqvae_layer_forward(x2, emb_weight, beta=beta,
                                     use_moving_avg=True)
    jax.block_until_ready((loss2, zq2))
    loss2_ref, zq2_ref = reference(x2, emb_weight, beta, True)
    assert jnp.allclose(zq2, zq2_ref, atol=1e-5), "z_q mismatch (ragged)"
    assert jnp.allclose(loss2, loss2_ref, atol=1e-5), "loss mismatch (ragged)"

    print("KERNEL_OK")
</pallas_src>

<mosaic_0001>
module attributes {stable_mosaic.version = 11 : i64} {
  func.func @_vq_kernel(%arg0: i32, %arg1: i32, %arg2: memref<1x32x256xf32, #tpu.memory_space<vmem>>, %arg3: memref<64x32xf32, #tpu.memory_space<vmem>>, %arg4: memref<32x64xf32, #tpu.memory_space<vmem>>, %arg5: memref<64x1xf32, #tpu.memory_space<vmem>>, %arg6: memref<1x32x256xf32, #tpu.memory_space<vmem>>, %arg7: memref<1x1x8x128xf32, #tpu.memory_space<vmem>>) attributes {dimension_semantics = [#tpu.dimension_semantics<parallel>, #tpu.dimension_semantics<parallel>], iteration_bounds = array<i64: 2, 1>, scalar_prefetch = 0 : i64, scratch_operands = 0 : i64, tpu.core_type = #tpu.core_type<tc>, window_params = [{transform_indices = @transform_0, window_bounds = array<i64: 1, 32, 256>}, {pipeline_mode = #tpu.pipeline_mode<synchronous>, transform_indices = @transform_1, window_bounds = array<i64: 64, 32>}, {pipeline_mode = #tpu.pipeline_mode<synchronous>, transform_indices = @transform_2, window_bounds = array<i64: 32, 64>}, {pipeline_mode = #tpu.pipeline_mode<synchronous>, transform_indices = @transform_3, window_bounds = array<i64: 64, 1>}, {transform_indices = @transform_4, window_bounds = array<i64: 1, 32, 256>}, {transform_indices = @transform_5, window_bounds = array<i64: 1, 1, 8, 128>}]} {
    %c0 = arith.constant 0 : index
    %c0_0 = arith.constant 0 : index
    %c0_1 = arith.constant 0 : index
    %0 = vector.load %arg2[%c0, %c0_0, %c0_1] : memref<1x32x256xf32, #tpu.memory_space<vmem>>, vector<1x32x256xf32>
    %1 = vector.shape_cast %0 : vector<1x32x256xf32> to vector<32x256xf32>
    %c0_2 = arith.constant 0 : index
    %c0_3 = arith.constant 0 : index
    %2 = vector.load %arg3[%c0_2, %c0_3] : memref<64x32xf32, #tpu.memory_space<vmem>>, vector<64x32xf32>
    %c0_4 = arith.constant 0 : index
    %c0_5 = arith.constant 0 : index
    %3 = vector.load %arg4[%c0_4, %c0_5] : memref<32x64xf32, #tpu.memory_space<vmem>>, vector<32x64xf32>
    %c0_6 = arith.constant 0 : index
    %c0_7 = arith.constant 0 : index
    %4 = vector.load %arg5[%c0_6, %c0_7] : memref<64x1xf32, #tpu.memory_space<vmem>>, vector<64x1xf32>
    %cst = arith.constant dense<0.000000e+00> : vector<64x256xf32>
    %5 = tpu.matmul %2, %1, %cst {dimension_numbers = #tpu.dot_dimension_numbers<[1], [0], [0], [1], [0, 0, 1, 1], [], []>} : vector<64x32xf32>, vector<32x256xf32>, vector<64x256xf32> -> vector<64x256xf32>
    %cst_8 = arith.constant 2.000000e+00 : f32
    %6 = vector.broadcast %cst_8 : f32 to vector<64x256xf32>
    %7 = arith.mulf %6, %5 : vector<64x256xf32>
    %8 = vector.broadcast %4 : vector<64x1xf32> to vector<64x256xf32>
    %9 = arith.subf %8, %7 : vector<64x256xf32>
    %cst_9 = arith.constant dense<0x7F800000> : vector<256xf32>
    %10 = vector.multi_reduction <minimumf>, %9, %cst_9 [0] : vector<64x256xf32> to vector<256xf32>
    %11 = vector.shape_cast %10 : vector<256xf32> to vector<1x256xf32>
    %12 = tpu.iota {dimensions = array<i32: 0>} : vector<64x256xi32>
    %13 = vector.broadcast %11 : vector<1x256xf32> to vector<64x256xf32>
    %14 = arith.cmpf oeq, %9, %13 : vector<64x256xf32>
    %c64_i32 = arith.constant 64 : i32
    %15 = vector.broadcast %c64_i32 : i32 to vector<64x256xi32>
    %16 = arith.select %14, %12, %15 : vector<64x256xi1>, vector<64x256xi32>
    %cst_10 = arith.constant dense<2147483647> : vector<256xi32>
    %17 = vector.multi_reduction <minsi>, %16, %cst_10 [0] : vector<64x256xi32> to vector<256xi32>
    %18 = vector.shape_cast %17 : vector<256xi32> to vector<1x256xi32>
    %19 = vector.broadcast %18 : vector<1x256xi32> to vector<64x256xi32>
    %20 = arith.cmpi eq, %12, %19 : vector<64x256xi32>
    %21 = arith.extui %20 : vector<64x256xi1> to vector<64x256xi32>
    %22 = arith.sitofp %21 : vector<64x256xi32> to vector<64x256xf32>
    %cst_11 = arith.constant dense<0.000000e+00> : vector<32x256xf32>
    %23 = tpu.matmul %3, %22, %cst_11 {dimension_numbers = #tpu.dot_dimension_numbers<[1], [0], [0], [1], [0, 0, 1, 1], [], []>} : vector<32x64xf32>, vector<64x256xf32>, vector<32x256xf32> -> vector<32x256xf32>
    %c0_12 = arith.constant 0 : index
    %c0_13 = arith.constant 0 : index
    %c0_14 = arith.constant 0 : index
    %24 = vector.load %arg6[%c0_12, %c0_13, %c0_14] : memref<1x32x256xf32, #tpu.memory_space<vmem>>, vector<1x32x256xf32>
    %25 = vector.shape_cast %24 : vector<1x32x256xf32> to vector<32x256xf32>
    %26 = vector.shape_cast %23 : vector<32x256xf32> to vector<1x32x256xf32>
    tpu.vector_store %arg6[%c0_12, %c0_13, %c0_14], %26 {strides = array<i32>} : memref<1x32x256xf32, #tpu.memory_space<vmem>>, vector<1x32x256xf32>,
    %27 = arith.subf %1, %23 : vector<32x256xf32>
    %28 = arith.mulf %27, %27 : vector<32x256xf32>
    %29 = vector.shape_cast %28 : vector<32x256xf32> to vector<1x32x256xf32>
    %cst_15 = arith.constant dense<0.000000e+00> : vector<1xf32>
    %30 = vector.multi_reduction <add>, %29, %cst_15 [1, 2] : vector<1x32x256xf32> to vector<1xf32>
    %31 = vector.shape_cast %30 : vector<1xf32> to vector<1x1x1xf32>
    %32 = vector.extract %31[0, 0, 0] : f32 from vector<1x1x1xf32>
    %33 = vector.broadcast %32 : f32 to vector<8x128xf32>
    %c0_16 = arith.constant 0 : index
    %c0_17 = arith.constant 0 : index
    %c0_18 = arith.constant 0 : index
    %c0_19 = arith.constant 0 : index
    %34 = vector.load %arg7[%c0_16, %c0_17, %c0_18, %c0_19] : memref<1x1x8x128xf32, #tpu.memory_space<vmem>>, vector<1x1x8x128xf32>
    %35 = vector.shape_cast %34 : vector<1x1x8x128xf32> to vector<8x128xf32>
    %36 = vector.shape_cast %33 : vector<8x128xf32> to vector<1x1x8x128xf32>
    tpu.vector_store %arg7[%c0_16, %c0_17, %c0_18, %c0_19], %36 {strides = array<i32>} : memref<1x1x8x128xf32, #tpu.memory_space<vmem>>, vector<1x1x8x128xf32>,
    return
  }
  func.func @transform_0(%arg0: i32, %arg1: i32) -> (i32, i32, i32) {
    %c0_i32 = arith.constant 0 : i32
    %c0_i32_0 = arith.constant 0 : i32
    return %arg0, %c0_i32, %arg1 : i32, i32, i32
  }
  func.func @transform_1(%arg0: i32, %arg1: i32) -> (i32, i32) {
    %c0_i32 = arith.constant 0 : i32
    %c0_i32_0 = arith.constant 0 : i32
    %c0_i32_1 = arith.constant 0 : i32
    return %c0_i32, %c0_i32_0 : i32, i32
  }
  func.func @transform_2(%arg0: i32, %arg1: i32) -> (i32, i32) {
    %c0_i32 = arith.constant 0 : i32
    %c0_i32_0 = arith.constant 0 : i32
    %c0_i32_1 = arith.constant 0 : i32
    return %c0_i32, %c0_i32_0 : i32, i32
  }
  func.func @transform_3(%arg0: i32, %arg1: i32) -> (i32, i32) {
    %c0_i32 = arith.constant 0 : i32
    %c0_i32_0 = arith.constant 0 : i32
    %c0_i32_1 = arith.constant 0 : i32
    return %c0_i32, %c0_i32_0 : i32, i32
  }
  func.func @transform_4(%arg0: i32, %arg1: i32) -> (i32, i32, i32) {
    %c0_i32 = arith.constant 0 : i32
    %c0_i32_0 = arith.constant 0 : i32
    return %arg0, %c0_i32, %arg1 : i32, i32, i32
  }
  func.func @transform_5(%arg0: i32, %arg1: i32) -> (i32, i32, i32, i32) {
    %c0_i32 = arith.constant 0 : i32
    %c0_i32_0 = arith.constant 0 : i32
    %c0_i32_1 = arith.constant 0 : i32
    return %arg0, %arg1, %c0_i32, %c0_i32_0 : i32, i32, i32, i32
  }
}

</mosaic_0001>

<bundles_post_ra>
// kernel: vqvae_layer_forward.1
= control target key start
LH: loop header
LB: loop body
LE: loop exit
PB: predicated region body
PF: predicated region fallthrough
CT: control target
= control target key end

     0   :  { %s1100_s18 = smov 0   ;;  %s1102_s19 = smov 0   ;;  %s1373_s0 = inlined_call_operand.vmem [shape: f32[2,32,256], index: 0, kind: input, shape index: {}]   ;;  %s1374_s1 = inlined_call_operand.vmem [shape: f32[64,32], index: 1, kind: input, shape index: {}]   ;;  %s1375_s2 = inlined_call_operand.vmem [shape: f32[32,64], index: 2, kind: input, shape index: {}]   ;;  %s1376_s3 = inlined_call_operand.vmem [shape: f32[64,1], index: 3, kind: input, shape index: {}]   ;;  %s1377_s4 = inlined_call_operand.vmem [shape: f32[2,32,256], index: 4, kind: output, shape index: {0}]   ;;  %s1378_s5 = inlined_call_operand.vmem [shape: f32[2,1,8,128], index: 5, kind: output, shape index: {1}]  }
   0x1   :  { %s1104_s20 = smov 0  }
   0x2 LB: > { %s28_s21 = sadd.s32 1, %s1061_s19  ;;  %p958_p0 = scmp.ge.s32.totalorder %s1065_s20, 1  ;;  %s1065_s20 = sphi %s1104_s20, %s16_s20   ;;  %s1061_s19 = sphi %s1102_s19, %s1380_s19   ;;  %s1057_s18 = sphi %s1100_s18, %s1379_s18  }
   0x3   : > { %p30_p1 = scmp.ge.s32.totalorder %s28_s21, 2  ;;  %p213_p2 = scmp.lt.s32.totalorder %s1065_s20, 3 }
   0x5   : > { %s1382_s21 = smov (%p30_p1, %s28_s21), 0  ;;  %p214_p3 = pnand %p958_p0, %p213_p2 }
   0x6   : > { %p257_p4 = scmp.lt.s32.totalorder (!%p214_p3), %s1057_s18, 1 }
   0x7   : > { %217 = sbr.rel (%p214_p3) target bundleno = 730 (0x2da), region = 36 }
   0xc   : > { %v1067_v0 = vmov 0.0   ;;  %s1384_s18 = smov (!%p257_p4, %s1057_s18), 1  ;;  %v1068_v1 = vmov 0   ;;  %v303_v2 = vld [vmem:[%s1376_s3] sm:$0xff]  ;;  %v305_v3 = vld [vmem:[%s1376_s3 + $0x10] sm:$0xff]  ;;  %v304_v4 = vld [vmem:[%s1376_s3 + $0x8] sm:$0xff] }
   0xd   : > { %400 = vmatprep.mubr.f32.mxu0 %v1067_v0  ;;  %759 = vmatprep.mubr.f32.mxu1 %v1067_v0  ;;  %s1010_s26 = sshll.u32 %s1384_s18, 6  ;;  %v306_v5 = vld [vmem:[%s1376_s3 + $0x18] sm:$0xff]  ;;  %v307_v11 = vld [vmem:[%s1376_s3 + $0x20] sm:$0xff]  ;;  %v308_v13 = vld [vmem:[%s1376_s3 + $0x28] sm:$0xff]  ;;  %vm311_vm0 = vcmask 261120  }
   0xe   : > { %1041 = vset.pattern.permute.xlu0 %v1068_v1  ;;  %1042 = vset.pattern.permute.xlu1 %v1068_v1  ;;  %s264_s6 = scalar_lea.vmem %s1373_s0, %s1010_s26  ;;  %v291_v16 = vld [vmem:[%s1374_s1] sm:$0xff]  ;;  %v309_v17 = vld [vmem:[%s1376_s3 + $0x30] sm:$0xff]  ;;  %v310_v18 = vld [vmem:[%s1376_s3 + $0x38] sm:$0xff]  ;;  %s1342_s28 = scalar_lea.vmem %s1377_s4, %s1010_s26 }
   0xf   : > { %467 = vperm.xlu0 %1041, %v303_v2   ;;  %477 = vperm.xlu1 %1042, %v305_v3   ;;  %v1140_v6 = vld [vmem:[%s264_s6 + $0x38] sm:$0xff]  ;;  %v1142_v7 = vld [vmem:[%s264_s6 + $0x30] sm:$0xff]  ;;  %v1144_v8 = vld [vmem:[%s264_s6 + $0x28] sm:$0xff]  ;;  %s963_s26 = sshll.u32 %s1384_s18, 3 }
  0x10   : > { %360 = vmatprep.subr.mxu0 %v1140_v6  ;;  %v1147_v9 = vld [vmem:[%s264_s6 + $0x20] sm:$0xff]  ;;  %v1150_v10 = vld [vmem:[%s264_s6 + $0x18] sm:$0xff]  ;;  %v1156_v12 = vld [vmem:[%s264_s6 + $0x10] sm:$0xff] }
  0x11   : > { %361 = vmatpush1.msra.mxu0 %v1142_v7  ;;  %v1162_v14 = vld [vmem:[%s264_s6 + $0x8] sm:$0xff]  ;;  %v1165_v15 = vld [vmem:[%s264_s6] sm:$0xff]  ;;  %v293_v20 = vld [vmem:[%s1374_s1 + $0x10] sm:$0xff]  ;;  %s282_s6 = scalar_lea.vmem %s1378_s5, %s963_s26 }
  0x12   : > { %362 = vmatprep.subr.mxu0 %v1144_v8  ;;  %v292_v19 = vld [vmem:[%s1374_s1 + $0x8] sm:$0xff]  ;;  %v294_v21 = vld [vmem:[%s1374_s1 + $0x18] sm:$0xff]  ;;  %v295_v22 = vld [vmem:[%s1374_s1 + $0x20] sm:$0xff] }
  0x13   : > { %472 = vperm.xlu0 %1041, %v304_v4   ;;  %482 = vperm.xlu1 %1042, %v306_v5   ;;  %v296_v23 = vld [vmem:[%s1374_s1 + $0x28] sm:$0xff]  ;;  %v297_v24 = vld [vmem:[%s1374_s1 + $0x30] sm:$0xff]  ;;  %v298_v25 = vld [vmem:[%s1374_s1 + $0x38] sm:$0xff] }
  0x14   : > { %363 = vmatpush1.msra.mxu0 %v1147_v9 }
  0x15   : > { %364 = vmatprep.subr.mxu0 %v1150_v10 }
  0x16   : > { %365 = vmatpush1.msra.mxu0 %v1156_v12 }
  0x17   : > { %487 = vperm.xlu0 %1041, %v307_v11   ;;  %492 = vperm.xlu1 %1042, %v308_v13  }
  0x18   : > { %366 = vmatprep.subr.mxu0 %v1162_v14 }
  0x19   : > { %367 = vmatpush1.msra.mxu0 %v1165_v15 }
  0x1a   : > { %964 = vmatmul.mubr.msk.f32.vlgmr.msra.gmra.mxu0 %vm311_vm0, %v291_v16 }
  0x1b   : > { %497 = vperm.xlu0 %1041, %v309_v17   ;;  %406 = vmatprep.mubr.f32.mxu0 %v1067_v0 }
  0x1c   : > { %502 = vperm.xlu1 %1042, %v310_v18  }
  0x1e   : > { %965 = vmatmul.mubr.msk.f32.gmra.mxu0 %vm311_vm0, %v292_v19 }
  0x1f   : > { %412 = vmatprep.mubr.f32.mxu0 %v1067_v0 }
  0x22   : > { %966 = vmatmul.mubr.msk.f32.gmra.mxu0 %vm311_vm0, %v293_v20 }
  0x23   : > { %418 = vmatprep.mubr.f32.mxu0 %v1067_v0 }
  0x26   : > { %967 = vmatmul.mubr.msk.f32.gmra.mxu0 %vm311_vm0, %v294_v21 }
  0x27   : > { %424 = vmatprep.mubr.f32.mxu0 %v1067_v0 }
  0x2a   : > { %968 = vmatmul.mubr.msk.f32.gmra.mxu0 %vm311_vm0, %v295_v22 }
  0x2b   : > { %430 = vmatprep.mubr.f32.mxu0 %v1067_v0 }
  0x2e   : > { %969 = vmatmul.mubr.msk.f32.gmra.mxu0 %vm311_vm0, %v296_v23 }
  0x2f   : > { %436 = vmatprep.mubr.f32.mxu0 %v1067_v0 }
  0x32   : > { %970 = vmatmul.mubr.msk.f32.gmra.mxu0 %vm311_vm0, %v297_v24 }
  0x33   : > { %442 = vmatprep.mubr.f32.mxu0 %v1067_v0 }
  0x36   : > { %971 = vmatmul.mubr.msk.f32.gmra.mxu0 %vm311_vm0, %v298_v25 }
  0x8a   : > { %v468_v32 = vpop.permute.xlu0 %467  ;;  %v478_v33 = vpop.permute.xlu1 %477 }
  0x8e   : > { %v473_v37 = vpop.permute.xlu0 %472  ;;  %v483_v38 = vpop.permute.xlu1 %482 }
  0x92   : > { %v488_v46 = vpop.permute.xlu0 %487  ;;  %v493_v54 = vpop.permute.xlu1 %492 }
  0x96   : > { %v498_v17 = vpop.permute.xlu0 %497 }
  0xda   : > { %v402_v26 = vpop.f32.mrf.mxu0 }
  0xdb   : > { %v449_v43 = vmul.f32 2.0, %v402_v26  ;;  %v503_v26 = vpop.permute.xlu1 %502 }
  0xdc   : > { %v404_v27 = vpop.f32.mrf.mxu0 }
  0xdd   : > { %v450_v51 = vmul.f32 2.0, %v404_v27  ;;  %v1219_v60 = vsub.f32 %v468_v32, %v449_v43  ;;  %v547_v43 = vlaneseq }
  0xde   : > { %v408_v28 = vpop.f32.mrf.mxu0 }
  0xdf   : > { %v451_v49 = vmul.f32 2.0, %v408_v28  ;;  %v1229_v5 = vsub.f32 %v468_v32, %v450_v51 }
  0xe0   : > { %v410_v29 = vpop.f32.mrf.mxu0 }
  0xe1   : > { %v452_v52 = vmul.f32 2.0, %v410_v29  ;;  %v507_v2 = vsub.f32 %v473_v37, %v451_v49 }
  0xe2   : > { %v414_v30 = vpop.f32.mrf.mxu0 }
  0xe3   : > { %v453_v40 = vmul.f32 2.0, %v414_v30  ;;  %v1231_v11 = vsub.f32 %v473_v37, %v452_v52 }
  0xe4   : > { %v416_v31 = vpop.f32.mrf.mxu0 }
  0xe5   : > { %v454_v44 = vmul.f32 2.0, %v416_v31  ;;  %v1215_v53 = vsub.f32 %v478_v33, %v453_v40 }
  0xe6   : > { %v420_v34 = vpop.f32.mrf.mxu0 }
  0xe7   : > { %v455_v42 = vmul.f32 2.0, %v420_v34  ;;  %v1221_v61 = vsub.f32 %v478_v33, %v454_v44  ;;  %v521_v13 = vmin.f32 %v1219_v60, %v1215_v53 }
  0xe8   : > { %v422_v35 = vpop.f32.mrf.mxu0 }
  0xe9   : > { %v456_v45 = vmul.f32 2.0, %v422_v35  ;;  %v1217_v57 = vsub.f32 %v483_v38, %v455_v42  ;;  %v534_v23 = vmin.f32 %v1229_v5, %v1221_v61 }
  0xea   : > { %v426_v36 = vpop.f32.mrf.mxu0 }
  0xeb   : > { %v457_v47 = vmul.f32 2.0, %v426_v36  ;;  %v1223_v62 = vsub.f32 %v483_v38, %v456_v45  ;;  %v522_v19 = vmin.f32 %v507_v2, %v1217_v57 }
  0xec   : > { %v428_v39 = vpop.f32.mrf.mxu0 }
  0xed   : > { %v458_v55 = vmul.f32 2.0, %v428_v39  ;;  %v1225_v63 = vsub.f32 %v488_v46, %v457_v47  ;;  %v535_v24 = vmin.f32 %v1231_v11, %v1223_v62 }
  0xee   : > { %v432_v41 = vpop.f32.mrf.mxu0 }
  0xef   : > { %v459_v50 = vmul.f32 2.0, %v432_v41  ;;  %v1235_v16 = vsub.f32 %v488_v46, %v458_v55  ;;  %v523_v25 = vmin.f32 %v521_v13, %v1225_v63 }
  0xf0   : > { %v434_v48 = vpop.f32.mrf.mxu0 }
  0xf1   : > { %v460_v58 = vmul.f32 2.0, %v434_v48  ;;  %v1227_v3 = vsub.f32 %v493_v54, %v459_v50  ;;  %v536_v32 = vmin.f32 %v534_v23, %v1235_v16  ;;  %v1254_v48 = vshrl.u32 %v547_v43, 7 }
  0xf2   : > { %v438_v56 = vpop.f32.mrf.mxu0 }
  0xf3   : > { %v461_v59 = vmul.f32 2.0, %v438_v56  ;;  %v1238_v20 = vsub.f32 %v493_v54, %v460_v58  ;;  %v524_v28 = vmin.f32 %v522_v19, %v1227_v3  ;;  %v1257_v54 = vadd.s32 8, %v1254_v48 }
  0xf4   : > { %v440_v1 = vpop.f32.mrf.mxu0  ;;  %v1260_v55 = vadd.s32 16, %v1254_v48  ;;  %v1263_v56 = vadd.s32 24, %v1254_v48  ;;  %v1266_v58 = vadd.s32 32, %v1254_v48  ;;  %v1278_v13 = vadd.s32 56, %v1254_v48 }
  0xf5   : > { %v462_v4 = vmul.f32 2.0, %v440_v1  ;;  %v517_v21 = vsub.f32 %v498_v17, %v461_v59  ;;  %v537_v33 = vmin.f32 %v535_v24, %v1238_v20  ;;  %v1269_v59 = vadd.s32 40, %v1254_v48 }
  0xf6   : > { %v444_v18 = vpop.f32.mrf.mxu0  ;;  %v1272_v1 = vadd.s32 48, %v1254_v48 }
  0xf7   : > { %v463_v22 = vmul.f32 2.0, %v444_v18  ;;  %v1246_v29 = vsub.f32 %v498_v17, %v462_v4  ;;  %v525_v34 = vmin.f32 %v523_v25, %v517_v21 }
  0xf8   : > { %v446_v27 = vpop.f32.mrf.mxu0 }
  0xf9   : > { %v519_v30 = vsub.f32 %v503_v26, %v463_v22  ;;  %v464_v31 = vmul.f32 2.0, %v446_v27  ;;  %v538_v37 = vmin.f32 %v536_v32, %v1246_v29 }
  0xfb   : > { %v526_v35 = vmin.f32 %v524_v28, %v519_v30  ;;  %v1250_v36 = vsub.f32 %v503_v26, %v464_v31 }
  0xfd   : > { %v527_v38 = vmin.f32 %v525_v34, %v526_v35  ;;  %v539_v39 = vmin.f32 %v537_v33, %v1250_v36 }
  0xff   : > { %v528_v40 = vrot.slane %v527_v38, 4  ;;  %v540_v41 = vmin.f32 %v538_v37, %v539_v39 }
 0x101   : > { %v529_v42 = vmin.f32 %v527_v38, %v528_v40  ;;  %v541_v44 = vrot.slane %v540_v41, 4 }
 0x103   : > { %v530_v45 = vrot.slane %v529_v42, 2  ;;  %v542_v46 = vmin.f32 %v540_v41, %v541_v44 }
 0x105   : > { %v531_v47 = vmin.f32 %v529_v42, %v530_v45  ;;  %v543_v49 = vrot.slane %v542_v46, 2 }
 0x107   : > { %v532_v50 = vrot.slane %v531_v47, 1  ;;  %v544_v51 = vmin.f32 %v542_v46, %v543_v49 }
 0x109   : > { %v533_v52 = vmin.f32 %v531_v47, %v532_v50  ;;  %v545_v4 = vrot.slane %v544_v51, 1  ;;  %v1069_v50 = vmov 1.0  }
 0x10b   : > { %vm556_vm1 = vcmp.eq.f32.partialorder %v1219_v60, %v533_v52  ;;  %vm558_vm2 = vcmp.eq.f32.partialorder %v507_v2, %v533_v52  ;;  %vm560_vm3 = vcmp.eq.f32.partialorder %v1215_v53, %v533_v52  ;;  %vm562_vm4 = vcmp.eq.f32.partialorder %v1217_v57, %v533_v52 }
 0x10c   : > { %vm564_vm5 = vcmp.eq.f32.partialorder %v1225_v63, %v533_v52  ;;  %vm566_vm6 = vcmp.eq.f32.partialorder %v1227_v3, %v533_v52  ;;  %vm568_vm7 = vcmp.eq.f32.partialorder %v517_v21, %v533_v52  ;;  %v572_v17 = vsel %vm556_vm1, %v1254_v48, 64 }
 0x10d   : > { %v574_v18 = vsel %vm558_vm2, %v1257_v54, 64  ;;  %v576_v19 = vsel %vm560_vm3, %v1260_v55, 64  ;;  %v578_v60 = vsel %vm562_vm4, %v1263_v56, 64  ;;  %vm570_vm8 = vcmp.eq.f32.partialorder %v519_v30, %v533_v52  ;;  %v300_v52 = vld [vmem:[%s1375_s2 + $0x8] sm:$0xff] }
 0x10e   : > { %v580_v53 = vsel %vm564_vm5, %v1266_v58, 64  ;;  %vm588_vm9 = vcmp.lt.s32.totalorder %v572_v17, %v576_v19  ;;  %vm590_vm10 = vcmp.lt.s32.totalorder %v574_v18, %v578_v60  ;;  %v546_v57 = vmin.f32 %v544_v51, %v545_v4  ;;  %v299_v51 = vld [vmem:[%s1375_s2] sm:$0xff] }
 0x10f   : > { %v582_v2 = vsel %vm566_vm6, %v1269_v59, 64  ;;  %v584_v63 = vsel %vm568_vm7, %v1272_v1, 64  ;;  %v589_v3 = vsel %vm588_vm9, %v572_v17, %v576_v19  ;;  %v591_v21 = vsel %vm590_vm10, %v574_v18, %v578_v60 }
 0x110   : > { %v586_v22 = vsel %vm570_vm8, %v1278_v13, 64  ;;  %vm592_vm11 = vcmp.lt.s32.totalorder %v589_v3, %v580_v53  ;;  %vm594_vm12 = vcmp.lt.s32.totalorder %v591_v21, %v582_v2  ;;  %vm557_vm13 = vcmp.eq.f32.partialorder %v1229_v5, %v546_v57 }
 0x111   : > { %v593_v23 = vsel %vm592_vm11, %v589_v3, %v580_v53  ;;  %v595_v24 = vsel %vm594_vm12, %v591_v21, %v582_v2  ;;  %vm559_vm14 = vcmp.eq.f32.partialorder %v1231_v11, %v546_v57  ;;  %vm561_vm15 = vcmp.eq.f32.partialorder %v1221_v61, %v546_v57 }
 0x112   : > { %vm596_vm0 = vcmp.lt.s32.totalorder %v593_v23, %v584_v63  ;;  %vm598_vm1 = vcmp.lt.s32.totalorder %v595_v24, %v586_v22  ;;  %vm563_vm2 = vcmp.eq.f32.partialorder %v1223_v62, %v546_v57  ;;  %vm565_vm3 = vcmp.eq.f32.partialorder %v1235_v16, %v546_v57 }
 0x113   : > { %v597_v25 = vsel %vm596_vm0, %v593_v23, %v584_v63  ;;  %v599_v26 = vsel %vm598_vm1, %v595_v24, %v586_v22  ;;  %v573_v27 = vsel %vm557_vm13, %v1254_v48, 64  ;;  %v575_v28 = vsel %vm559_vm14, %v1257_v54, 64 }
 0x114   : > { %vm600_vm4 = vcmp.lt.s32.totalorder %v597_v25, %v599_v26  ;;  %v577_v5 = vsel %vm561_vm15, %v1260_v55, 64  ;;  %vm567_vm5 = vcmp.eq.f32.partialorder %v1238_v20, %v546_v57  ;;  %v579_v61 = vsel %vm563_vm2, %v1263_v56, 64 }
 0x115   : > { %v601_v30 = vsel %vm600_vm4, %v597_v25, %v599_v26  ;;  %vm569_vm6 = vcmp.eq.f32.partialorder %v1246_v29, %v546_v57  ;;  %vm611_vm7 = vcmp.lt.s32.totalorder %v573_v27, %v577_v5  ;;  %vm571_vm8 = vcmp.eq.f32.partialorder %v1250_v36, %v546_v57 }
 0x116   : > { %v602_v11 = vrot.slane %v601_v30, 4  ;;  %v581_v62 = vsel %vm565_vm3, %v1266_v58, 64  ;;  %v612_v16 = vsel %vm611_vm7, %v573_v27, %v577_v5  ;;  %vm613_vm9 = vcmp.lt.s32.totalorder %v575_v28, %v579_v61 }
 0x117   : > { %v583_v31 = vsel %vm567_vm5, %v1269_v59, 64  ;;  %v614_v32 = vsel %vm613_vm9, %v575_v28, %v579_v61  ;;  %vm615_vm11 = vcmp.lt.s32.totalorder %v612_v16, %v581_v62  ;;  %v585_v20 = vsel %vm569_vm6, %v1272_v1, 64 }
 0x118   : > { %vm603_vm10 = vcmp.lt.s32.totalorder %v601_v30, %v602_v11  ;;  %v616_v34 = vsel %vm615_vm11, %v612_v16, %v581_v62  ;;  %vm617_vm12 = vcmp.lt.s32.totalorder %v614_v32, %v583_v31  ;;  %v587_v29 = vsel %vm571_vm8, %v1278_v13, 64 }
 0x119   : > { %v604_v33 = vsel %vm603_vm10, %v601_v30, %v602_v11  ;;  %v618_v37 = vsel %vm617_vm12, %v614_v32, %v583_v31  ;;  %vm619_vm13 = vcmp.lt.s32.totalorder %v616_v34, %v585_v20 }
 0x11a   : > { %v605_v35 = vrot.slane %v604_v33, 2  ;;  %v620_v36 = vsel %vm619_vm13, %v616_v34, %v585_v20  ;;  %vm621_vm14 = vcmp.lt.s32.totalorder %v618_v37, %v587_v29 }
 0x11b   : > { %v622_v38 = vsel %vm621_vm14, %v618_v37, %v587_v29 }
 0x11c   : > { %vm606_vm15 = vcmp.lt.s32.totalorder %v604_v33, %v605_v35  ;;  %vm623_vm0 = vcmp.lt.s32.totalorder %v620_v36, %v622_v38 }
 0x11d   : > { %v624_v39 = vsel %vm623_vm0, %v620_v36, %v622_v38  ;;  %v607_v40 = vsel %vm606_vm15, %v604_v33, %v605_v35 }
 0x11e   : > { %v625_v41 = vrot.slane %v624_v39, 4  ;;  %v608_v42 = vrot.slane %v607_v40, 1 }
 0x120   : > { %vm626_vm1 = vcmp.lt.s32.totalorder %v624_v39, %v625_v41  ;;  %vm609_vm3 = vcmp.lt.s32.totalorder %v607_v40, %v608_v42 }
 0x121   : > { %v627_v43 = vsel %vm626_vm1, %v624_v39, %v625_v41  ;;  %v610_v47 = vsel %vm609_vm3, %v607_v40, %v608_v42 }
 0x122   : > { %v628_v44 = vrot.slane %v627_v43, 2  ;;  %vm648_vm6 = vcmp.eq.s32.totalorder %v1278_v13, %v610_v47  ;;  %vm646_vm8 = vcmp.eq.s32.totalorder %v1272_v1, %v610_v47  ;;  %vm644_vm10 = vcmp.eq.s32.totalorder %v1269_v59, %v610_v47 }
 0x123   : > { %vm642_vm12 = vcmp.eq.s32.totalorder %v1266_v58, %v610_v47  ;;  %vm640_vm14 = vcmp.eq.s32.totalorder %v1263_v56, %v610_v47  ;;  %vm638_vm0 = vcmp.eq.s32.totalorder %v1260_v55, %v610_v47 }
 0x124   : > { %vm629_vm2 = vcmp.lt.s32.totalorder %v627_v43, %v628_v44 }
 0x125   : > { %v630_v45 = vsel %vm629_vm2, %v627_v43, %v628_v44  ;;  %vm636_vm2 = vcmp.eq.s32.totalorder %v1257_v54, %v610_v47 }
 0x126   : > { %v631_v46 = vrot.slane %v630_v45, 1 }
 0x128   : > { %vm632_vm4 = vcmp.lt.s32.totalorder %v630_v45, %v631_v46 }
 0x129   : > { %v633_v49 = vsel %vm632_vm4, %v630_v45, %v631_v46  ;;  %vm682_vm4 = vcmask 523264  }
 0x12a   : > { %vm649_vm5 = vcmp.eq.s32.totalorder %v1278_v13, %v633_v49  ;;  %vm647_vm7 = vcmp.eq.s32.totalorder %v1272_v1, %v633_v49  ;;  %vm645_vm9 = vcmp.eq.s32.totalorder %v1269_v59, %v633_v49  ;;  %vm643_vm11 = vcmp.eq.s32.totalorder %v1266_v58, %v633_v49 }
 0x12b   : > { %988 = vmatprep.subr.msk.mxu1 %vm649_vm5, %v1069_v50  ;;  %vm641_vm13 = vcmp.eq.s32.totalorder %v1263_v56, %v633_v49  ;;  %vm639_vm15 = vcmp.eq.s32.totalorder %v1260_v55, %v633_v49  ;;  %vm637_vm1 = vcmp.eq.s32.totalorder %v1257_v54, %v633_v49  ;;  %vm635_vm3 = vcmp.eq.s32.totalorder %v1254_v48, %v633_v49  ;;  %v301_v54 = vld [vmem:[%s1375_s2 + $0x10] sm:$0xff] }
 0x12c   : > { %989 = vmatpush1.msk.msra.mxu1 %vm648_vm6, %v1069_v50  ;;  %vm634_vm5 = vcmp.eq.s32.totalorder %v1254_v48, %v610_v47  ;;  %v302_v48 = vld [vmem:[%s1375_s2 + $0x18] sm:$0xff] }
 0x12d   : > { %990 = vmatprep.subr.msk.mxu1 %vm647_vm7, %v1069_v50 }
 0x12e   : > { %991 = vmatpush1.msk.msra.mxu1 %vm646_vm8, %v1069_v50 }
 0x12f   : > { %992 = vmatprep.subr.msk.mxu1 %vm645_vm9, %v1069_v50 }
 0x130   : > { %993 = vmatpush1.msk.msra.mxu1 %vm644_vm10, %v1069_v50 }
 0x131   : > { %994 = vmatprep.subr.msk.mxu1 %vm643_vm11, %v1069_v50 }
 0x132   : > { %995 = vmatpush1.msk.msra.mxu1 %vm642_vm12, %v1069_v50 }
 0x133   : > { %996 = vmatprep.subr.msk.mxu1 %vm641_vm13, %v1069_v50 }
 0x134   : > { %997 = vmatpush1.msk.msra.mxu1 %vm640_vm14, %v1069_v50 }
 0x135   : > { %998 = vmatprep.subr.msk.mxu1 %vm639_vm15, %v1069_v50 }
 0x136   : > { %999 = vmatpush1.msk.msra.mxu1 %vm638_vm0, %v1069_v50 }
 0x137   : > { %1000 = vmatprep.subr.msk.mxu1 %vm637_vm1, %v1069_v50 }
 0x138   : > { %1001 = vmatpush1.msk.msra.mxu1 %vm636_vm2, %v1069_v50 }
 0x139   : > { %1002 = vmatprep.subr.msk.mxu1 %vm635_vm3, %v1069_v50 }
 0x13a   : > { %1003 = vmatpush1.msk.msra.mxu1 %vm634_vm5, %v1069_v50 }
 0x13b   : > { %1004 = vmatmul.mubr.msk.f32.vlgmr.msra.gmra.mxu1 %vm682_vm4, %v299_v51 }
 0x13c   : > { %765 = vmatprep.mubr.f32.mxu1 %v1067_v0 }
 0x13f   : > { %1005 = vmatmul.mubr.msk.f32.gmra.mxu1 %vm682_vm4, %v300_v52 }
 0x140   : > { %771 = vmatprep.mubr.f32.mxu1 %v1067_v0 }
 0x143   : > { %1006 = vmatmul.mubr.msk.f32.gmra.mxu1 %vm682_vm4, %v301_v54 }
 0x144   : > { %777 = vmatprep.mubr.f32.mxu1 %v1067_v0 }
 0x147   : > { %1007 = vmatmul.mubr.msk.f32.gmra.mxu1 %vm682_vm4, %v302_v48 }
 0x1fb   : > { %v761_v55 = vpop.f32.mrf.mxu1 }
 0x1fc   : > { %784 = vst [vmem:[%s1342_s28] sm:$0xff] %v761_v55  ;;  %v792_v56 = vsub.f32 %v1165_v15, %v761_v55 }
 0x1fd   : > { %v763_v0 = vpop.f32.mrf.mxu1 }
 0x1fe   : > { %785 = vst [vmem:[%s1342_s28 + $0x8] sm:$0xff] %v763_v0  ;;  %v793_v58 = vsub.f32 %v1162_v14, %v763_v0  ;;  %v800_v1 = vmul.f32 %v792_v56, %v792_v56 }
 0x1ff   : > { %v767_v59 = vpop.f32.mrf.mxu1 }
 0x200   : > { %v801_v4 = vmul.f32 %v793_v58, %v793_v58  ;;  %786 = vst [vmem:[%s1342_s28 + $0x10] sm:$0xff] %v767_v59  ;;  %v794_v13 = vsub.f32 %v1156_v12, %v767_v59 }
 0x201   : > { %v769_v17 = vpop.f32.mrf.mxu1 }
 0x202   : > { %v808_v18 = vadd.f32 %v801_v4, %v800_v1  ;;  %v802_v19 = vmul.f32 %v794_v13, %v794_v13  ;;  %787 = vst [vmem:[%s1342_s28 + $0x18] sm:$0xff] %v769_v17  ;;  %v795_v60 = vsub.f32 %v1150_v10, %v769_v17 }
 0x203   : > { %v773_v15 = vpop.f32.mrf.mxu1 }
 0x204   : > { %v809_v53 = vadd.f32 %v808_v18, %v802_v19  ;;  %v803_v57 = vmul.f32 %v795_v60, %v795_v60  ;;  %788 = vst [vmem:[%s1342_s28 + $0x20] sm:$0xff] %v773_v15  ;;  %v796_v14 = vsub.f32 %v1147_v9, %v773_v15 }
 0x205   : > { %v775_v2 = vpop.f32.mrf.mxu1 }
 0x206   : > { %v810_v63 = vadd.f32 %v809_v53, %v803_v57  ;;  %v804_v3 = vmul.f32 %v796_v14, %v796_v14  ;;  %789 = vst [vmem:[%s1342_s28 + $0x28] sm:$0xff] %v775_v2  ;;  %v797_v12 = vsub.f32 %v1144_v8, %v775_v2 }
 0x207   : > { %v779_v21 = vpop.f32.mrf.mxu1 }
 0x208   : > { %v811_v22 = vadd.f32 %v810_v63, %v804_v3  ;;  %v805_v23 = vmul.f32 %v797_v12, %v797_v12  ;;  %790 = vst [vmem:[%s1342_s28 + $0x30] sm:$0xff] %v779_v21  ;;  %v798_v24 = vsub.f32 %v1142_v7, %v779_v21 }
 0x209   : > { %v781_v10 = vpop.f32.mrf.mxu1 }
 0x20a   : > { %v812_v25 = vadd.f32 %v811_v22, %v805_v23  ;;  %v806_v26 = vmul.f32 %v798_v24, %v798_v24  ;;  %791 = vst [vmem:[%s1342_s28 + $0x38] sm:$0xff] %v781_v10  ;;  %v799_v27 = vsub.f32 %v1140_v6, %v781_v10 }
 0x20c   : > { %v807_v9 = vmul.f32 %v799_v27, %v799_v27  ;;  %v813_v28 = vadd.f32 %v812_v25, %v806_v26 }
 0x20e   : > { %v814_v5 = vadd.f32 %v813_v28, %v807_v9 }
 0x210   : > { %815 = vadd.xlane.f32.xlu0 %v814_v5 }
 0x299   : > { %v816_v30 = vpop.xlane.xlu0 %815 }
 0x29a   : > { %v817_v61 = vrot.slane %v816_v30, 4 }
 0x29c   : > { %v818_v8 = vadd.f32 %v817_v61, %v816_v30 }
 0x29e   : > { %v819_v11 = vrot.slane %v818_v8, 2 }
 0x2a0   : > { %v820_v62 = vadd.f32 %v819_v11, %v818_v8 }
 0x2a2   : > { %v821_v16 = vrot.slane %v820_v62, 1 }
 0x2a4   : > { %v822_v31 = vadd.f32 %v821_v16, %v820_v62 }
 0x2a6   : > { %1012 = vpush %v822_v31 }
 0x2d7   : > { %s1013_s7 = spop %1012 }
 0x2d8   : > { %v824_v7 = vstv %s1013_s7 }
 0x2d9   : > { %825 = vst [vmem:[%s282_s6] sm:$0xff] %v824_v7 }
 0x2da PF: > { %s16_s20 = sadd.s32 1, %s1065_s20   ;;  %s1379_s18 = smov %s1061_s19 }
 0x2db   : > { %p13_p5 = scmp.ge.s32.totalorder %s16_s20, 4   ;;  %s1380_s19 = smov %s1382_s21 }
 0x2dd   :  { %15 = sbr.rel (!%p13_p5) target bundleno = 2 (0x2), region = 78 }

</bundles_post_ra>
